<compile_context>
chip_gen: v7x
topology: tpu7x:2x2x1
jax: 0.10.0
libtpu: 0.0.40
codegen_flags: <defaults>
</compile_context>

<pallas_src>
import jax
import jax.numpy as jnp
from jax.experimental import pallas as pl
from jax.experimental.pallas import tpu as pltpu


_PER_BLOCK_BYTES = 2 * 1024 * 1024  # target bytes per input block (double-buffered)


def _block_partial(x):
    """x: (TB, H, R) block.  Returns (1, 1, R) f32 partial:
    sum over batch and rows of |x[:, i, :] - x[:, i+1, :]| for i in [0, H-2]."""
    h = x.shape[1]
    # Bring row i+1 onto row i with a sublane rotation (XLU) instead of
    # sublane-offset slices (which force relayout copies).
    x_next = pltpu.roll(x, shift=h - 1, axis=1)        # row i <- row (i+1) mod h
    d = jnp.abs(x - x_next)                            # input dtype
    rows = jax.lax.broadcasted_iota(jnp.int32, d.shape, 1)
    d = jnp.where(rows < h - 1, d, jnp.zeros_like(d))  # drop wrapped last row
    # Reduce batch + sublanes with f32 accumulation; keep lanes (the cross-lane
    # reduce is deferred to the wrapper over tiny partials).
    return jnp.sum(d.astype(jnp.float32), axis=(0, 1), keepdims=True)


def _tv_kernel_1(x_ref, o_ref):
    o_ref[...] = _block_partial(x_ref[...])


def _tv_kernel_2(x_ref, y_ref, o_ref):
    o_ref[...] = _block_partial(x_ref[...]) + _block_partial(y_ref[...])


def _tv_abs_diff_sum(tensors):
    """tensors: list of 1 or 2 same-shape/dtype (B, H, R) arrays.
    Returns f32 scalar: sum over tensors of sum_{b, i<H-1, j} |t[b,i,j]-t[b,i+1,j]|."""
    b, h, r = tensors[0].shape
    itemsize = jnp.dtype(tensors[0].dtype).itemsize
    row_bytes = h * r * itemsize

    # Largest divisor of B whose block stays under the per-block byte target
    # (divisor => no ragged last block, no in-kernel batch masking needed).
    max_tb = max(1, _PER_BLOCK_BYTES // row_bytes)
    tb = 1
    for cand in range(1, min(b, max_tb) + 1):
        if b % cand == 0:
            tb = cand
    grid = b // tb

    n = len(tensors)
    needed = n * 2 * tb * row_bytes + 2 * r * 4 + (2 << 20)  # 2x-buffered ins + outs + slack
    cp = {"dimension_semantics": ("parallel",)}
    if needed > (12 << 20):  # only override when the default scoped budget is tight
        cp["vmem_limit_bytes"] = int(min(needed, 60 << 20))

    kernel = _tv_kernel_1 if n == 1 else _tv_kernel_2
    partials = pl.pallas_call(
        kernel,
        out_shape=jax.ShapeDtypeStruct((grid, 1, r), jnp.float32),
        grid=(grid,),
        in_specs=[pl.BlockSpec((tb, h, r), lambda i: (i, 0, 0))] * n,
        out_specs=pl.BlockSpec((1, 1, r), lambda i: (i, 0, 0)),
        compiler_params=pltpu.CompilerParams(**cp),
    )(*tensors)
    return jnp.sum(partials)


def _as_b_h_r(img):
    """(N, C, H, ...) -> (N*C, H, prod(rest)).  Contiguous reshape, no copy."""
    s = img.shape
    r = 1
    for d in s[3:]:
        r *= d
    return img.reshape(s[0] * s[1], s[2], r)


def total_variation_loss(x, y):
    """Pallas TPU implementation of TotalVariationLoss.forward(x, y)."""
    xm = _as_b_h_r(x)
    ym = _as_b_h_r(y)
    # Mean divisors = number of diff elements = B * (H - 1) * R.
    nx = xm.shape[0] * (xm.shape[1] - 1) * xm.shape[2]
    ny = ym.shape[0] * (ym.shape[1] - 1) * ym.shape[2]
    if xm.shape == ym.shape and xm.dtype == ym.dtype:
        # One launch, two input streams, one fused scale (identical divisors).
        return _tv_abs_diff_sum([xm, ym]) / nx
    return _tv_abs_diff_sum([xm]) / nx + _tv_abs_diff_sum([ym]) / ny


if __name__ == "__main__":
    key = jax.random.PRNGKey(0)
    kx, ky = jax.random.split(key)

    # Small NCHW inputs consistent with the module's dim-2 slicing semantics.
    x = jax.random.normal(kx, (2, 4, 16, 16), dtype=jnp.float32)
    y = jax.random.normal(ky, (2, 4, 16, 16), dtype=jnp.float32)

    loss = jax.jit(total_variation_loss)(x, y)
    jax.block_until_ready(loss)

    # Pure-JAX reference for sanity check.
    ref = (jnp.mean(jnp.abs(x[:, :, :-1] - x[:, :, 1:]))
           + jnp.mean(jnp.abs(y[:, :, :-1] - y[:, :, 1:])))
    assert jnp.allclose(loss, ref, rtol=1e-5, atol=1e-6), (loss, ref)

    print("KERNEL_OK")
</pallas_src>

<mosaic_0001>
module attributes {stable_mosaic.version = 11 : i64} {
  func.func @_tv_kernel_2(%arg0: i32, %arg1: memref<8x16x16xf32, #tpu.memory_space<vmem>>, %arg2: memref<8x16x16xf32, #tpu.memory_space<vmem>>, %arg3: memref<1x1x16xf32, #tpu.memory_space<vmem>>) attributes {dimension_semantics = [#tpu.dimension_semantics<parallel>], iteration_bounds = array<i64: 1>, scalar_prefetch = 0 : i64, scratch_operands = 0 : i64, tpu.core_type = #tpu.core_type<tc>, window_params = [{transform_indices = @transform_0, window_bounds = array<i64: 8, 16, 16>}, {transform_indices = @transform_1, window_bounds = array<i64: 8, 16, 16>}, {transform_indices = @transform_2, window_bounds = array<i64: 1, 1, 16>}]} {
    %c0 = arith.constant 0 : index
    %c0_0 = arith.constant 0 : index
    %c0_1 = arith.constant 0 : index
    %0 = vector.load %arg1[%c0, %c0_0, %c0_1] : memref<8x16x16xf32, #tpu.memory_space<vmem>>, vector<8x16x16xf32>
    %c15_i32 = arith.constant 15 : i32
    %1 = tpu.dynamic_rotate %0 by %c15_i32 dim 1 : vector<8x16x16xf32>, i32 -> vector<8x16x16xf32>
    %2 = arith.subf %0, %1 : vector<8x16x16xf32>
    %3 = math.absf %2 : vector<8x16x16xf32>
    %4 = tpu.iota {dimensions = array<i32: 1>} : vector<8x16x16xi32>
    %c15_i32_2 = arith.constant 15 : i32
    %5 = vector.broadcast %c15_i32_2 : i32 to vector<8x16x16xi32>
    %6 = arith.cmpi slt, %4, %5 : vector<8x16x16xi32>
    %cst = arith.constant 0.000000e+00 : f32
    %7 = vector.broadcast %cst : f32 to vector<8x16x16xf32>
    %8 = arith.select %6, %3, %7 : vector<8x16x16xi1>, vector<8x16x16xf32>
    %cst_3 = arith.constant dense<0.000000e+00> : vector<16xf32>
    %9 = vector.multi_reduction <add>, %8, %cst_3 [0, 1] : vector<8x16x16xf32> to vector<16xf32>
    %10 = vector.shape_cast %9 : vector<16xf32> to vector<1x1x16xf32>
    %c0_4 = arith.constant 0 : index
    %c0_5 = arith.constant 0 : index
    %c0_6 = arith.constant 0 : index
    %11 = vector.load %arg2[%c0_4, %c0_5, %c0_6] : memref<8x16x16xf32, #tpu.memory_space<vmem>>, vector<8x16x16xf32>
    %c15_i32_7 = arith.constant 15 : i32
    %12 = tpu.dynamic_rotate %11 by %c15_i32_7 dim 1 : vector<8x16x16xf32>, i32 -> vector<8x16x16xf32>
    %13 = arith.subf %11, %12 : vector<8x16x16xf32>
    %14 = math.absf %13 : vector<8x16x16xf32>
    %15 = tpu.iota {dimensions = array<i32: 1>} : vector<8x16x16xi32>
    %c15_i32_8 = arith.constant 15 : i32
    %16 = vector.broadcast %c15_i32_8 : i32 to vector<8x16x16xi32>
    %17 = arith.cmpi slt, %15, %16 : vector<8x16x16xi32>
    %cst_9 = arith.constant 0.000000e+00 : f32
    %18 = vector.broadcast %cst_9 : f32 to vector<8x16x16xf32>
    %19 = arith.select %17, %14, %18 : vector<8x16x16xi1>, vector<8x16x16xf32>
    %cst_10 = arith.constant dense<0.000000e+00> : vector<16xf32>
    %20 = vector.multi_reduction <add>, %19, %cst_10 [0, 1] : vector<8x16x16xf32> to vector<16xf32>
    %21 = vector.shape_cast %20 : vector<16xf32> to vector<1x1x16xf32>
    %22 = arith.addf %10, %21 : vector<1x1x16xf32>
    %c0_11 = arith.constant 0 : index
    %c0_12 = arith.constant 0 : index
    %c0_13 = arith.constant 0 : index
    %23 = vector.load %arg3[%c0_11, %c0_12, %c0_13] : memref<1x1x16xf32, #tpu.memory_space<vmem>>, vector<1x1x16xf32>
    tpu.vector_store %arg3[%c0_11, %c0_12, %c0_13], %22 {strides = array<i32>} : memref<1x1x16xf32, #tpu.memory_space<vmem>>, vector<1x1x16xf32>,
    return
  }
  func.func @transform_0(%arg0: i32) -> (i32, i32, i32) {
    %c0_i32 = arith.constant 0 : i32
    %c0_i32_0 = arith.constant 0 : i32
    %c0_i32_1 = arith.constant 0 : i32
    return %arg0, %c0_i32, %c0_i32_0 : i32, i32, i32
  }
  func.func @transform_1(%arg0: i32) -> (i32, i32, i32) {
    %c0_i32 = arith.constant 0 : i32
    %c0_i32_0 = arith.constant 0 : i32
    %c0_i32_1 = arith.constant 0 : i32
    return %arg0, %c0_i32, %c0_i32_0 : i32, i32, i32
  }
  func.func @transform_2(%arg0: i32) -> (i32, i32, i32) {
    %c0_i32 = arith.constant 0 : i32
    %c0_i32_0 = arith.constant 0 : i32
    %c0_i32_1 = arith.constant 0 : i32
    return %arg0, %c0_i32, %c0_i32_0 : i32, i32, i32
  }
}

</mosaic_0001>

<bundles_post_ra>
// kernel: total_variation_loss.1
= control target key start
LH: loop header
LB: loop body
LE: loop exit
PB: predicated region body
PF: predicated region fallthrough
CT: control target
= control target key end

     0   :  { %7 = vsyncpa [#allocation3], 0  ;;  %s625_s0 = inlined_call_operand.hbm [shape: f32[8,16,16], index: 0, kind: input, shape index: {}]   ;;  %s626_s1 = inlined_call_operand.hbm [shape: f32[8,16,16], index: 1, kind: input, shape index: {}]   ;;  %s627_s2 = inlined_call_operand.vmem [shape: f32[1,1,16], index: 2, kind: output, shape index: {}]  }
   0x1   :  { %8 = vsyncpa [#allocation5], 0  ;;  %s373_s9 = smov [#allocation2]   ;;  %s325_s13 = scalar_lea.hbm %s625_s0, 2048 }
   0x2   :  { %s14_s10 = sshll.u32 %s373_s9, 4  ;;  %p326_p0 = scmp.ne.s32.totalorder %s625_s0, %s325_s13  ;;  %s15_s10 = int_to_ptr.vmem [resolvable:$true] %s14_s10 }
   0x3   :  { %p329_p1 = scmp.lt.u32.totalorder %s325_s13, %s625_s0 }
   0x5   :  { %p331_p2 = pnand %p329_p1, %p326_p0 }
   0x7   :  { %334 = shalt.err (!%p331_p2)
}
   0x8   :  { %s335_s18 = scalar_lea.vmem %s15_s10, 2048  ;;  %p340_p4 = scmp.lt.s32.totalorder %s15_s10, %s15_s10 }
   0x9   :  { %p336_p3 = scmp.ne.s32.totalorder %s15_s10, %s335_s18  ;;  %p341_p5 = scmp.lt.s32.totalorder %s335_s18, %s335_s18 }
   0xb   :  { %p342_p6 = por %p341_p5, %p340_p4 }
   0xd   :  { %p343_p7 = pnand %p342_p6, %p336_p3 }
   0xf   :  { %346 = shalt.err (!%p343_p7)
}
  0x10   :  { %s374_s19 = smov 128   ;;  %s375_s20 = smov 8  }
  0x11   :  { %20 = dma.hbm_to_vmem [thread:$0]  %s625_s0, 2048, %s15_s10, [#allocation3], %s374_s19, %s374_s19, %s375_s20  }
  0x12   :  { %s376_s23 = smov [#allocation4]   ;;  %s347_s27 = scalar_lea.hbm %s626_s1, 2048 }
  0x13   :  { %s26_s24 = sshll.u32 %s376_s23, 4  ;;  %p348_p8 = scmp.ne.s32.totalorder %s626_s1, %s347_s27  ;;  %s27_s24 = int_to_ptr.vmem [resolvable:$true] %s26_s24 }
  0x14   :  { %p351_p9 = scmp.lt.u32.totalorder %s347_s27, %s626_s1 }
  0x16   :  { %p353_p10 = pnand %p351_p9, %p348_p8 }
  0x18   :  { %356 = shalt.err (!%p353_p10)
}
  0x19   :  { %s357_s4 = scalar_lea.vmem %s27_s24, 2048  ;;  %p362_p12 = scmp.lt.s32.totalorder %s27_s24, %s27_s24 }
  0x1a   :  { %p358_p11 = scmp.ne.s32.totalorder %s27_s24, %s357_s4  ;;  %p363_p13 = scmp.lt.s32.totalorder %s357_s4, %s357_s4 }
  0x1c   :  { %p364_p0 = por %p363_p13, %p362_p12 }
  0x1e   :  { %p365_p1 = pnand %p364_p0, %p358_p11 }
  0x20   :  { %368 = shalt.err (!%p365_p1)
}
  0x21   :  { %32 = dma.hbm_to_vmem [thread:$0]  %s626_s1, 2048, %s27_s24, [#allocation5], %s374_s19, %s374_s19, %s375_s20  }
  0x22   :  { %369 = dma.done.wait [#allocation3], 2048  }
  0x23   :  { %370 = vsyncadd [#allocation3], 4294965248 }
  0x24   :  { %371 = dma.done.wait [#allocation5], 2048  }
  0x25   :  { %372 = vsyncadd [#allocation5], 4294965248  ;;  %v71_v0 = vlaneseq  ;;  %v39_v1 = vld [vmem:[#allocation2] sm:$0xff]  ;;  %v40_v2 = vld [vmem:[#allocation2 + $0x8] sm:$0xff]  ;;  %vm141_vm2 = vcmask 130048   ;;  %vm313_vm3 = vcmask 122880  }
  0x26   :  { %v41_v4 = vld [vmem:[#allocation2 + $0x10] sm:$0xff]  ;;  %v42_v5 = vld [vmem:[#allocation2 + $0x18] sm:$0xff]  ;;  %v55_v6 = vrot.slane %v39_v1, 1  ;;  %v63_v7 = vrot.slane %v40_v2, 1  ;;  %v43_v10 = vld [vmem:[#allocation2 + $0x20] sm:$0xff] }
  0x27   :  { %v416_v3 = vshrl.u32 %v71_v0, 7  ;;  %v56_v8 = vrot.slane %v41_v4, 1  ;;  %v64_v9 = vrot.slane %v42_v5, 1  ;;  %v44_v11 = vld [vmem:[#allocation2 + $0x28] sm:$0xff]  ;;  %v57_v13 = vrot.slane %v43_v10, 1  ;;  %v45_v16 = vld [vmem:[#allocation2 + $0x30] sm:$0xff] }
  0x28   :  { %v65_v14 = vrot.slane %v44_v11, 1  ;;  %v46_v17 = vld [vmem:[#allocation2 + $0x38] sm:$0xff]  ;;  %v430_v23 = vld [vmem:[#allocation2 + $0x40] sm:$0xff]  ;;  %v48_v24 = vld [vmem:[#allocation2 + $0x48] sm:$0xff]  ;;  %v58_v25 = vrot.slane %v45_v16, 1 }
  0x29   :  { %vm73_vm0 = vcmp.lt.s32.totalorder %v416_v3, 7  ;;  %v428_v21 = vadd.s32 8, %v416_v3  ;;  %v66_v26 = vrot.slane %v46_v17, 1  ;;  %v437_v32 = vld [vmem:[#allocation2 + $0x50] sm:$0xff]  ;;  %v59_v33 = vrot.slane %v430_v23, 1  ;;  %v50_v42 = vld [vmem:[#allocation2 + $0x58] sm:$0xff] }
  0x2a   :  { %v82_v12 = vsel %vm73_vm0, %v63_v7, %v55_v6  ;;  %v83_v15 = vsel %vm73_vm0, %v64_v9, %v56_v8  ;;  %v74_v18 = vsel %vm73_vm0, %v55_v6, %v63_v7  ;;  %v75_v19 = vsel %vm73_vm0, %v56_v8, %v64_v9  ;;  %v457_v58 = vld [vmem:[#allocation2 + $0x60] sm:$0xff]  ;;  %v459_v59 = vld [vmem:[#allocation2 + $0x70] sm:$0xff]  ;;  %v463_v0 = vld [vmem:[#allocation2 + $0x68] sm:$0xff] }
  0x2b   :  { %v91_v20 = vsub.f32 %v40_v2, %v82_v12  ;;  %v93_v22 = vsub.f32 %v42_v5, %v83_v15  ;;  %v84_v27 = vsel %vm73_vm0, %v65_v14, %v57_v13  ;;  %v90_v28 = vsub.f32 %v39_v1, %v74_v18  ;;  %v467_v5 = vld [vmem:[#allocation2 + $0x78] sm:$0xff]  ;;  %v476_v12 = vld [vmem:[#allocation4] sm:$0xff]  ;;  %v481_v18 = vld [vmem:[#allocation4 + $0x10] sm:$0xff] }
  0x2c   :  { %v76_v29 = vsel %vm73_vm0, %v57_v13, %v65_v14  ;;  %v92_v30 = vsub.f32 %v41_v4, %v75_v19  ;;  %vm124_vm1 = vcmp.lt.s32.totalorder %v428_v21, 15  ;;  %v67_v34 = vrot.slane %v48_v24, 1  ;;  %v180_v13 = vld [vmem:[#allocation4 + $0x8] sm:$0xff]  ;;  %v182_v19 = vld [vmem:[#allocation4 + $0x18] sm:$0xff] }
  0x2d   :  { %v107_v31 = vand.u32 2147483647, %v91_v20  ;;  %v95_v35 = vsub.f32 %v44_v11, %v84_v27  ;;  %v109_v36 = vand.u32 2147483647, %v93_v22  ;;  %v85_v37 = vsel %vm73_vm0, %v66_v26, %v58_v25 }
  0x2e   :  { %v94_v38 = vsub.f32 %v43_v10, %v76_v29  ;;  %v106_v39 = vand.u32 2147483647, %v90_v28  ;;  %v77_v40 = vsel %vm73_vm0, %v58_v25, %v66_v26  ;;  %v108_v41 = vand.u32 2147483647, %v92_v30 }
  0x2f   :  { %v60_v43 = vrot.slane %v437_v32, 1  ;;  %v126_v44 = vsel %vm124_vm1, %v107_v31, 0.0  ;;  %v86_v45 = vsel %vm73_vm0, %v67_v34, %v59_v33  ;;  %v97_v46 = vsub.f32 %v46_v17, %v85_v37 }
  0x30   :  { %v111_v47 = vand.u32 2147483647, %v95_v35  ;;  %v128_v48 = vsel %vm124_vm1, %v109_v36, 0.0  ;;  %v96_v49 = vsub.f32 %v45_v16, %v77_v40  ;;  %v110_v50 = vand.u32 2147483647, %v94_v38  ;;  %v491_v35 = vld [vmem:[#allocation4 + $0x20] sm:$0xff] }
  0x31   :  { %v142_v51 = vsel %vm141_vm2, %v106_v39, 0.0  ;;  %v143_v52 = vsel %vm141_vm2, %v126_v44, 0.0  ;;  %v68_v53 = vrot.slane %v50_v42, 1  ;;  %v78_v54 = vsel %vm73_vm0, %v59_v33, %v67_v34  ;;  %v493_v36 = vld [vmem:[#allocation4 + $0x28] sm:$0xff] }
  0x32   :  { %v144_v55 = vadd.f32 %v143_v52, %v142_v51  ;;  %v145_v56 = vsel %vm141_vm2, %v108_v41, 0.0  ;;  %v147_v57 = vsel %vm141_vm2, %v128_v48, 0.0  ;;  %v99_v60 = vsub.f32 %v48_v24, %v86_v45  ;;  %v505_v45 = vld [vmem:[#allocation4 + $0x30] sm:$0xff] }
  0x33   :  { %v113_v61 = vand.u32 2147483647, %v97_v46  ;;  %v130_v62 = vsel %vm124_vm1, %v111_v47, 0.0  ;;  %v98_v1 = vsub.f32 %v430_v23, %v78_v54  ;;  %v112_v2 = vand.u32 2147483647, %v96_v49  ;;  %v507_v46 = vld [vmem:[#allocation4 + $0x38] sm:$0xff] }
  0x34   :  { %v146_v63 = vadd.f32 %v145_v56, %v144_v55  ;;  %v149_v4 = vsel %vm141_vm2, %v110_v50, 0.0  ;;  %v87_v6 = vsel %vm73_vm0, %v68_v53, %v60_v43  ;;  %v61_v8 = vrot.slane %v457_v58, 1 }
  0x35   :  { %v62_v9 = vrot.slane %v459_v59, 1  ;;  %v79_v10 = vsel %vm73_vm0, %v60_v43, %v68_v53  ;;  %v151_v11 = vsel %vm141_vm2, %v130_v62, 0.0  ;;  %v69_v14 = vrot.slane %v463_v0, 1 }
  0x36   :  { %v148_v7 = vadd.f32 %v147_v57, %v146_v63  ;;  %v115_v15 = vand.u32 2147483647, %v99_v60  ;;  %v132_v16 = vsel %vm124_vm1, %v113_v61, 0.0  ;;  %v70_v20 = vrot.slane %v467_v5, 1  ;;  %v525_v61 = vld [vmem:[#allocation4 + $0x40] sm:$0xff] }
  0x37   :  { %v101_v22 = vsub.f32 %v50_v42, %v87_v6  ;;  %v114_v23 = vand.u32 2147483647, %v98_v1  ;;  %v153_v24 = vsel %vm141_vm2, %v112_v2, 0.0  ;;  %v100_v25 = vsub.f32 %v437_v32, %v79_v10 }
  0x38   :  { %v150_v17 = vadd.f32 %v149_v4, %v148_v7  ;;  %v195_v27 = vrot.slane %v476_v12, 1  ;;  %v203_v28 = vrot.slane %v180_v13, 1  ;;  %v155_v29 = vsel %vm141_vm2, %v132_v16, 0.0 }
  0x39   :  { %v196_v30 = vrot.slane %v481_v18, 1  ;;  %v204_v31 = vrot.slane %v182_v19, 1  ;;  %v134_v33 = vsel %vm124_vm1, %v115_v15, 0.0  ;;  %v80_v32 = vsel %vm73_vm0, %v61_v8, %v69_v14 }
  0x3a   :  { %v152_v26 = vadd.f32 %v151_v11, %v150_v17  ;;  %v81_v37 = vsel %vm73_vm0, %v62_v9, %v70_v20  ;;  %v117_v38 = vand.u32 2147483647, %v101_v22  ;;  %v157_v39 = vsel %vm141_vm2, %v114_v23, 0.0  ;;  %v546_v17 = vld [vmem:[#allocation4 + $0x58] sm:$0xff] }
  0x3b   :  { %v88_v40 = vsel %vm73_vm0, %v69_v14, %v61_v8  ;;  %v116_v41 = vand.u32 2147483647, %v100_v25  ;;  %v219_v43 = vsel %vm73_vm0, %v203_v28, %v195_v27  ;;  %v159_v44 = vsel %vm141_vm2, %v134_v33, 0.0 }
  0x3c   :  { %v154_v34 = vadd.f32 %v153_v24, %v152_v26  ;;  %v197_v47 = vrot.slane %v491_v35, 1  ;;  %v205_v48 = vrot.slane %v493_v36, 1  ;;  %v220_v49 = vsel %vm73_vm0, %v204_v31, %v196_v30 }
  0x3d   :  { %v102_v50 = vsub.f32 %v457_v58, %v80_v32  ;;  %v211_v52 = vsel %vm73_vm0, %v195_v27, %v203_v28  ;;  %v212_v53 = vsel %vm73_vm0, %v196_v30, %v204_v31  ;;  %v520_v54 = vsel %vm73_vm0, %v70_v20, %v62_v9  ;;  %v527_v58 = vld [vmem:[#allocation4 + $0x48] sm:$0xff]  ;;  %v556_v28 = vld [vmem:[#allocation4 + $0x60] sm:$0xff] }
  0x3e   :  { %v156_v42 = vadd.f32 %v155_v29, %v154_v34  ;;  %v103_v55 = vsub.f32 %v463_v0, %v88_v40  ;;  %v136_v56 = vsel %vm124_vm1, %v117_v38, 0.0  ;;  %v228_v57 = vsub.f32 %v180_v13, %v219_v43  ;;  %v542_v13 = vld [vmem:[#allocation4 + $0x50] sm:$0xff] }
  0x3f   :  { %v198_v62 = vrot.slane %v505_v45, 1  ;;  %v206_v63 = vrot.slane %v507_v46, 1  ;;  %v230_v1 = vsub.f32 %v182_v19, %v220_v49  ;;  %v161_v2 = vsel %vm141_vm2, %v116_v41, 0.0 }
  0x40   :  { %v158_v51 = vadd.f32 %v157_v39, %v156_v42  ;;  %v221_v4 = vsel %vm73_vm0, %v205_v48, %v197_v47  ;;  %v227_v0 = vsub.f32 %v476_v12, %v211_v52  ;;  %v229_v6 = vsub.f32 %v481_v18, %v212_v53  ;;  %v194_v52 = vld [vmem:[#allocation4 + $0x78] sm:$0xff] }
  0x41   :  { %v104_v7 = vsub.f32 %v459_v59, %v81_v37  ;;  %v105_v8 = vsub.f32 %v467_v5, %v520_v54  ;;  %v118_v9 = vand.u32 2147483647, %v102_v50  ;;  %v213_v10 = vsel %vm73_vm0, %v197_v47, %v205_v48 }
  0x42   :  { %v160_v60 = vadd.f32 %v159_v44, %v158_v51  ;;  %v163_v11 = vsel %vm141_vm2, %v136_v56, 0.0  ;;  %v199_v14 = vrot.slane %v525_v61, 1  ;;  %v207_v15 = vrot.slane %v527_v58, 1 }
  0x43   :  { %v244_v12 = vand.u32 2147483647, %v228_v57  ;;  %v214_v59 = vsel %vm73_vm0, %v198_v62, %v206_v63  ;;  %v232_v5 = vsub.f32 %v493_v36, %v221_v4  ;;  %v246_v18 = vand.u32 2147483647, %v230_v1 }
  0x44   :  { %v162_v16 = vadd.f32 %v161_v2, %v160_v60  ;;  %v222_v19 = vsel %vm73_vm0, %v206_v63, %v198_v62  ;;  %v231_v20 = vsub.f32 %v491_v35, %v213_v10  ;;  %v243_v22 = vand.u32 2147483647, %v227_v0  ;;  %v192_v35 = vld [vmem:[#allocation4 + $0x68] sm:$0xff] }
  0x45   :  { %v245_v23 = vand.u32 2147483647, %v229_v6  ;;  %v119_v24 = vand.u32 2147483647, %v103_v55  ;;  %v120_v25 = vand.u32 2147483647, %v104_v7  ;;  %v223_v30 = vsel %vm73_vm0, %v207_v15, %v199_v14 }
  0x46   :  { %v165_v26 = vsel %vm141_vm2, %v118_v9, 0.0  ;;  %v200_v27 = vrot.slane %v542_v13, 1  ;;  %v208_v29 = vrot.slane %v546_v17, 1  ;;  %v233_v31 = vsub.f32 %v505_v45, %v214_v59 }
  0x47   :  { %v260_v33 = vsel %vm124_vm1, %v244_v12, 0.0  ;;  %v164_v34 = vadd.f32 %v163_v11, %v162_v16  ;;  %v234_v36 = vsub.f32 %v507_v46, %v222_v19  ;;  %v248_v32 = vand.u32 2147483647, %v232_v5  ;;  %v193_v46 = vld [vmem:[#allocation4 + $0x70] sm:$0xff] }
  0x48   :  { %v262_v37 = vsel %vm124_vm1, %v246_v18, 0.0  ;;  %v247_v38 = vand.u32 2147483647, %v231_v20  ;;  %v275_v39 = vsel %vm141_vm2, %v243_v22, 0.0  ;;  %v276_v40 = vsel %vm141_vm2, %v260_v33, 0.0 }
  0x49   :  { %v278_v41 = vsel %vm141_vm2, %v245_v23, 0.0  ;;  %v138_v42 = vsel %vm124_vm1, %v119_v24, 0.0  ;;  %v201_v43 = vrot.slane %v556_v28, 1  ;;  %v215_v44 = vsel %vm73_vm0, %v199_v14, %v207_v15 }
  0x4a   :  { %v277_v45 = vadd.f32 %v276_v40, %v275_v39  ;;  %v209_v47 = vrot.slane %v192_v35, 1  ;;  %v224_v48 = vsel %vm73_vm0, %v208_v29, %v200_v27  ;;  %v236_v49 = vsub.f32 %v527_v58, %v223_v30 }
  0x4b   :  { %v280_v50 = vsel %vm141_vm2, %v262_v37, 0.0  ;;  %v166_v51 = vadd.f32 %v165_v26, %v164_v34  ;;  %v250_v53 = vand.u32 2147483647, %v234_v36  ;;  %v264_v54 = vsel %vm124_vm1, %v248_v32, 0.0 }
  0x4c   :  { %v279_v55 = vadd.f32 %v278_v41, %v277_v45  ;;  %v167_v56 = vsel %vm141_vm2, %v138_v42, 0.0  ;;  %v235_v57 = vsub.f32 %v525_v61, %v215_v44  ;;  %v249_v60 = vand.u32 2147483647, %v233_v31 }
  0x4d   :  { %v282_v62 = vsel %vm141_vm2, %v247_v38, 0.0  ;;  %v121_v63 = vand.u32 2147483647, %v105_v8  ;;  %v202_v1 = vrot.slane %v193_v46, 1  ;;  %v216_v58 = vsel %vm73_vm0, %v200_v27, %v208_v29 }
  0x4e   :  { %v281_v2 = vadd.f32 %v280_v50, %v279_v55  ;;  %v210_v4 = vrot.slane %v194_v52, 1  ;;  %v225_v0 = vsel %vm73_vm0, %v209_v47, %v201_v43  ;;  %v238_v6 = vsub.f32 %v546_v17, %v224_v48 }
  0x4f   :  { %v284_v7 = vsel %vm141_vm2, %v264_v54, 0.0  ;;  %v168_v9 = vadd.f32 %v167_v56, %v166_v51  ;;  %v252_v10 = vand.u32 2147483647, %v236_v49  ;;  %v266_v61 = vsel %vm124_vm1, %v250_v53, 0.0 }
  0x50   :  { %v283_v11 = vadd.f32 %v282_v62, %v281_v2  ;;  %v169_v8 = vsel %vm141_vm2, %v120_v25, 0.0  ;;  %v237_v14 = vsub.f32 %v542_v13, %v216_v58  ;;  %v251_v15 = vand.u32 2147483647, %v235_v57 }
  0x51   :  { %v286_v12 = vsel %vm141_vm2, %v249_v60, 0.0  ;;  %v140_v16 = vsel %vm124_vm1, %v121_v63, 0.0  ;;  %v217_v17 = vsel %vm73_vm0, %v201_v43, %v209_v47  ;;  %v226_v5 = vsel %vm73_vm0, %v210_v4, %v202_v1 }
  0x52   :  { %v285_v59 = vadd.f32 %v284_v7, %v283_v11  ;;  %v240_v18 = vsub.f32 %v192_v35, %v225_v0  ;;  %v288_v19 = vsel %vm141_vm2, %v266_v61, 0.0  ;;  %v170_v20 = vadd.f32 %v169_v8, %v168_v9 }
  0x53   :  { %v254_v22 = vand.u32 2147483647, %v238_v6  ;;  %v268_v13 = vsel %vm124_vm1, %v252_v10, 0.0  ;;  %v171_v24 = vsel %vm141_vm2, %v140_v16, 0.0  ;;  %v239_v25 = vsub.f32 %v556_v28, %v217_v17 }
  0x54   :  { %v287_v23 = vadd.f32 %v286_v12, %v285_v59  ;;  %v253_v26 = vand.u32 2147483647, %v237_v14  ;;  %v290_v27 = vsel %vm141_vm2, %v251_v15, 0.0  ;;  %v218_v29 = vsel %vm73_vm0, %v202_v1, %v210_v4 }
  0x55   :  { %v242_v31 = vsub.f32 %v194_v52, %v226_v5  ;;  %v292_v33 = vsel %vm141_vm2, %v268_v13, 0.0  ;;  %v172_v34 = vadd.f32 %v171_v24, %v170_v20  ;;  %v256_v35 = vand.u32 2147483647, %v240_v18 }
  0x56   :  { %v289_v30 = vadd.f32 %v288_v19, %v287_v23  ;;  %v270_v36 = vsel %vm124_vm1, %v254_v22, 0.0  ;;  %v241_v37 = vsub.f32 %v193_v46, %v218_v29  ;;  %v255_v38 = vand.u32 2147483647, %v239_v25 }
  0x57   :  { %v294_v28 = vsel %vm141_vm2, %v253_v26, 0.0  ;;  %v296_v40 = vsel %vm141_vm2, %v270_v36, 0.0  ;;  %v173_v41 = vrot.slane %v172_v34, 4  ;;  %v258_v3 = vand.u32 2147483647, %v242_v31 }
  0x58   :  { %v291_v32 = vadd.f32 %v290_v27, %v289_v30  ;;  %v272_v42 = vsel %vm124_vm1, %v256_v35, 0.0  ;;  %v257_v44 = vand.u32 2147483647, %v241_v37  ;;  %v298_v45 = vsel %vm141_vm2, %v255_v38, 0.0 }
  0x59   :  { %v300_v48 = vsel %vm141_vm2, %v272_v42, 0.0  ;;  %v174_v49 = vadd.f32 %v173_v41, %v172_v34  ;;  %v274_v46 = vsel %vm124_vm1, %v258_v3, 0.0 }
  0x5a   :  { %v293_v39 = vadd.f32 %v292_v33, %v291_v32  ;;  %v302_v51 = vsel %vm141_vm2, %v257_v44, 0.0  ;;  %v304_v53 = vsel %vm141_vm2, %v274_v46, 0.0 }
  0x5b   :  { %v175_v54 = vrot.slane %v174_v49, 2 }
  0x5c   :  { %v295_v43 = vadd.f32 %v294_v28, %v293_v39 }
  0x5d   :  { %v176_v57 = vadd.f32 %v175_v54, %v174_v49 }
  0x5e   :  { %v297_v47 = vadd.f32 %v296_v40, %v295_v43 }
  0x5f   :  { %v177_v63 = vrot.slane %v176_v57, 1 }
  0x60   :  { %v299_v50 = vadd.f32 %v298_v45, %v297_v47 }
  0x61   :  { %v178_v2 = vadd.f32 %v177_v63, %v176_v57 }
  0x62   :  { %v301_v52 = vadd.f32 %v300_v48, %v299_v50 }
  0x64   :  { %v303_v55 = vadd.f32 %v302_v51, %v301_v52 }
  0x66   :  { %v305_v56 = vadd.f32 %v304_v53, %v303_v55 }
  0x68   :  { %v306_v60 = vrot.slane %v305_v56, 4 }
  0x6a   :  { %v307_v62 = vadd.f32 %v306_v60, %v305_v56 }
  0x6c   :  { %v308_v1 = vrot.slane %v307_v62, 2 }
  0x6e   :  { %v309_v58 = vadd.f32 %v308_v1, %v307_v62 }
  0x70   :  { %v310_v4 = vrot.slane %v309_v58, 1 }
  0x72   :  { %v311_v0 = vadd.f32 %v310_v4, %v309_v58 }
  0x74   :  { %v312_v21 = vadd.f32 %v311_v0, %v178_v2 }
  0x76   :  { %314 = vst.msk [vmem:[%s627_s2] sm:$0x1] %vm313_vm3, %v312_v21 }
  0x77   :  { %319 = vsyncpa [#allocation3], 1 }
  0x78   :  { %320 = vsyncpa [#allocation5], 1 }

</bundles_post_ra>
